<compile_context>
chip_gen: v7x
topology: tpu7x:2x2x1
jax: 0.10.0
libtpu: 0.0.40
codegen_flags: <defaults>
</compile_context>

<pallas_src>
import functools

import jax
import jax.numpy as jnp
from jax.experimental import pallas as pl
from jax.experimental.pallas import tpu as pltpu

INPUT_DIM = 50
PADDED_DIM = 64
HIDDEN1 = 128
HIDDEN2 = 64


def _mlp_kernel(x_ref, w1_ref, b1_ref, w2_ref, b2_ref, wh_ref, bh_ref, out_ref):
    # x_ref: (PADDED_DIM, block_b)   — batch on lanes
    # w1_ref: (H1, PADDED_DIM), w2_ref: (H2, H1), wh_ref: (2, H2)
    # biases: (H1,1), (H2,1), (2,1)  — f32
    x = x_ref[...]

    # encoder layer 1: Linear + ReLU   (Dropout = identity in eval mode)
    h1 = jnp.dot(w1_ref[...], x, preferred_element_type=jnp.float32) + b1_ref[...]
    h1 = jnp.maximum(h1, 0.0).astype(x.dtype)                      # (H1, block_b)

    # encoder layer 2: Linear + ReLU
    h2 = jnp.dot(w2_ref[...], h1, preferred_element_type=jnp.float32) + b2_ref[...]
    h2 = jnp.maximum(h2, 0.0).astype(x.dtype)                      # (H2, block_b)

    # fused heads: row 0 = mean logits, row 1 = var logits
    logits = jnp.dot(wh_ref[...], h2, preferred_element_type=jnp.float32) + bh_ref[...]
    row = jax.lax.broadcasted_iota(jnp.int32, logits.shape, 0)     # (2, block_b)
    out_ref[...] = jnp.where(
        row == 0,
        jax.nn.sigmoid(logits),                 # mean head
        jax.nn.softplus(logits) + 1e-6,         # variance head
    )


@functools.partial(jax.jit, static_argnames=("block_b", "compute_dtype"))
def probabilistic_nn_forward(x, params, block_b=512, compute_dtype=jnp.float32):
    """x: [B, INPUT_DIM] float32. Returns (mean [B,1], variance [B,1]) float32."""
    B, D = x.shape
    assert D == INPUT_DIM

    # Pad batch to a multiple of block_b and features 50 -> 64; transpose so batch is on lanes.
    n_blocks = pl.cdiv(B, block_b)
    B_pad = n_blocks * block_b
    x_p = jnp.pad(x.astype(compute_dtype), ((0, B_pad - B), (0, PADDED_DIM - D)))
    x_t = x_p.T                                                     # (PADDED_DIM, B_pad)

    # Weights: PyTorch [out, in] layout; pad w1's K dim; fuse the two heads.
    w1 = jnp.pad(params["w1"].astype(compute_dtype), ((0, 0), (0, PADDED_DIM - D)))
    w2 = params["w2"].astype(compute_dtype)
    wh = jnp.concatenate([params["wm"], params["wv"]], axis=0).astype(compute_dtype)  # (2, H2)

    # Biases stay f32 (added to the f32 accumulator).
    b1 = params["b1"].astype(jnp.float32).reshape(HIDDEN1, 1)
    b2 = params["b2"].astype(jnp.float32).reshape(HIDDEN2, 1)
    bh = jnp.concatenate([params["bm"], params["bv"]], axis=0).astype(jnp.float32).reshape(2, 1)

    full = lambda arr: pl.BlockSpec(arr.shape, lambda i: tuple(0 for _ in arr.shape))
    in_specs = [
        pl.BlockSpec((PADDED_DIM, block_b), lambda i: (0, i)),      # x^T, tiled over batch
        full(w1), full(b1),
        full(w2), full(b2),
        full(wh), full(bh),
    ]
    out_spec = pl.BlockSpec((2, block_b), lambda i: (0, i))         # lane-dense [2, B] output

    out = pl.pallas_call(
        _mlp_kernel,
        out_shape=jax.ShapeDtypeStruct((2, B_pad), jnp.float32),
        grid_spec=pltpu.PrefetchScalarGridSpec(
            num_scalar_prefetch=0,
            grid=(n_blocks,),
            in_specs=in_specs,
            out_specs=out_spec,
        ),
        compiler_params=pltpu.CompilerParams(
            dimension_semantics=("parallel",)),
    )(x_t, w1, b1, w2, b2, wh, bh)

    mean = out[0, :B][:, None]
    var = out[1, :B][:, None]
    return mean, var


def init_params(key):
    """Deterministic init in PyTorch nn.Linear layout: W [out, in], b [out]."""
    ks = jax.random.split(key, 8)

    def linear(kw, kb, fan_in, fan_out):
        bound = 1.0 / jnp.sqrt(jnp.float32(fan_in))
        w = jax.random.uniform(kw, (fan_out, fan_in), jnp.float32, -bound, bound)
        b = jax.random.uniform(kb, (fan_out,), jnp.float32, -bound, bound)
        return w, b

    w1, b1 = linear(ks[0], ks[1], INPUT_DIM, HIDDEN1)
    w2, b2 = linear(ks[2], ks[3], HIDDEN1, HIDDEN2)
    wm, bm = linear(ks[4], ks[5], HIDDEN2, 1)
    wv, bv = linear(ks[6], ks[7], HIDDEN2, 1)
    return dict(w1=w1, b1=b1, w2=w2, b2=b2, wm=wm, bm=bm, wv=wv, bv=bv)


def reference_forward(x, p):
    h1 = jnp.maximum(x @ p["w1"].T + p["b1"], 0.0)
    h2 = jnp.maximum(h1 @ p["w2"].T + p["b2"], 0.0)
    mean = jax.nn.sigmoid(h2 @ p["wm"].T + p["bm"])
    var = jax.nn.softplus(h2 @ p["wv"].T + p["bv"]) + 1e-6
    return mean, var


if __name__ == "__main__":
    key = jax.random.PRNGKey(0)
    k_param, k_x, k_x2 = jax.random.split(key, 3)

    params = init_params(k_param)

    # Small-batch correctness check (f32 path; batch padded up to one 512-row tile).
    B = 8
    x = jax.random.normal(k_x, (B, INPUT_DIM), jnp.float32)
    mean, var = probabilistic_nn_forward(x, params)
    jax.block_until_ready((mean, var))
    ref_mean, ref_var = reference_forward(x, params)
    assert mean.shape == (B, 1) and var.shape == (B, 1)
    assert jnp.allclose(mean, ref_mean, atol=1e-5, rtol=1e-5)
    assert jnp.allclose(var, ref_var, atol=1e-5, rtol=1e-5)

    # Non-divisible batch + multi-step grid (exercises padding and >1 grid steps).
    B2 = 300
    x2 = jax.random.normal(k_x2, (B2, INPUT_DIM), jnp.float32)
    mean2, var2 = probabilistic_nn_forward(x2, params, block_b=256)
    jax.block_until_ready((mean2, var2))
    ref_mean2, ref_var2 = reference_forward(x2, params)
    assert mean2.shape == (B2, 1) and var2.shape == (B2, 1)
    assert jnp.allclose(mean2, ref_mean2, atol=1e-5, rtol=1e-5)
    assert jnp.allclose(var2, ref_var2, atol=1e-5, rtol=1e-5)

    # bf16-operand path (f32 accumulation) for v6e/v7x bandwidth; looser tolerance.
    mean_bf, var_bf = probabilistic_nn_forward(x, params, compute_dtype=jnp.bfloat16)
    jax.block_until_ready((mean_bf, var_bf))
    assert jnp.allclose(mean_bf, ref_mean, atol=2e-2, rtol=2e-2)
    assert jnp.allclose(var_bf, ref_var, atol=2e-2, rtol=2e-2)

    print("KERNEL_OK")
</pallas_src>

<mosaic_0001>
module attributes {stable_mosaic.version = 11 : i64} {
  func.func @_mlp_kernel(%arg0: i32, %arg1: memref<64x512xf32, #tpu.memory_space<vmem>>, %arg2: memref<128x64xf32, #tpu.memory_space<vmem>>, %arg3: memref<128x1xf32, #tpu.memory_space<vmem>>, %arg4: memref<64x128xf32, #tpu.memory_space<vmem>>, %arg5: memref<64x1xf32, #tpu.memory_space<vmem>>, %arg6: memref<2x64xf32, #tpu.memory_space<vmem>>, %arg7: memref<2x1xf32, #tpu.memory_space<vmem>>, %arg8: memref<2x512xf32, #tpu.memory_space<vmem>>) attributes {dimension_semantics = [#tpu.dimension_semantics<parallel>], iteration_bounds = array<i64: 1>, scalar_prefetch = 0 : i64, scratch_operands = 0 : i64, tpu.core_type = #tpu.core_type<tc>, window_params = [{transform_indices = @transform_0, window_bounds = array<i64: 64, 512>}, {pipeline_mode = #tpu.pipeline_mode<synchronous>, transform_indices = @transform_1, window_bounds = array<i64: 128, 64>}, {pipeline_mode = #tpu.pipeline_mode<synchronous>, transform_indices = @transform_2, window_bounds = array<i64: 128, 1>}, {pipeline_mode = #tpu.pipeline_mode<synchronous>, transform_indices = @transform_3, window_bounds = array<i64: 64, 128>}, {pipeline_mode = #tpu.pipeline_mode<synchronous>, transform_indices = @transform_4, window_bounds = array<i64: 64, 1>}, {pipeline_mode = #tpu.pipeline_mode<synchronous>, transform_indices = @transform_5, window_bounds = array<i64: 2, 64>}, {pipeline_mode = #tpu.pipeline_mode<synchronous>, transform_indices = @transform_6, window_bounds = array<i64: 2, 1>}, {transform_indices = @transform_7, window_bounds = array<i64: 2, 512>}]} {
    %c0 = arith.constant 0 : index
    %c0_0 = arith.constant 0 : index
    %0 = vector.load %arg1[%c0, %c0_0] : memref<64x512xf32, #tpu.memory_space<vmem>>, vector<64x512xf32>
    %c0_1 = arith.constant 0 : index
    %c0_2 = arith.constant 0 : index
    %1 = vector.load %arg2[%c0_1, %c0_2] : memref<128x64xf32, #tpu.memory_space<vmem>>, vector<128x64xf32>
    %cst = arith.constant dense<0.000000e+00> : vector<128x512xf32>
    %2 = tpu.matmul %1, %0, %cst {dimension_numbers = #tpu.dot_dimension_numbers<[1], [0], [0], [1], [0, 0, 1, 1], [], []>} : vector<128x64xf32>, vector<64x512xf32>, vector<128x512xf32> -> vector<128x512xf32>
    %c0_3 = arith.constant 0 : index
    %c0_4 = arith.constant 0 : index
    %3 = vector.load %arg3[%c0_3, %c0_4] : memref<128x1xf32, #tpu.memory_space<vmem>>, vector<128x1xf32>
    %4 = vector.broadcast %3 : vector<128x1xf32> to vector<128x512xf32>
    %5 = arith.addf %2, %4 : vector<128x512xf32>
    %cst_5 = arith.constant 0.000000e+00 : f32
    %6 = vector.broadcast %cst_5 : f32 to vector<128x512xf32>
    %7 = arith.maximumf %5, %6 : vector<128x512xf32>
    %c0_6 = arith.constant 0 : index
    %c0_7 = arith.constant 0 : index
    %8 = vector.load %arg4[%c0_6, %c0_7] : memref<64x128xf32, #tpu.memory_space<vmem>>, vector<64x128xf32>
    %cst_8 = arith.constant dense<0.000000e+00> : vector<64x512xf32>
    %9 = tpu.matmul %8, %7, %cst_8 {dimension_numbers = #tpu.dot_dimension_numbers<[1], [0], [0], [1], [0, 0, 1, 1], [], []>} : vector<64x128xf32>, vector<128x512xf32>, vector<64x512xf32> -> vector<64x512xf32>
    %c0_9 = arith.constant 0 : index
    %c0_10 = arith.constant 0 : index
    %10 = vector.load %arg5[%c0_9, %c0_10] : memref<64x1xf32, #tpu.memory_space<vmem>>, vector<64x1xf32>
    %11 = vector.broadcast %10 : vector<64x1xf32> to vector<64x512xf32>
    %12 = arith.addf %9, %11 : vector<64x512xf32>
    %cst_11 = arith.constant 0.000000e+00 : f32
    %13 = vector.broadcast %cst_11 : f32 to vector<64x512xf32>
    %14 = arith.maximumf %12, %13 : vector<64x512xf32>
    %c0_12 = arith.constant 0 : index
    %c0_13 = arith.constant 0 : index
    %15 = vector.load %arg6[%c0_12, %c0_13] : memref<2x64xf32, #tpu.memory_space<vmem>>, vector<2x64xf32>
    %cst_14 = arith.constant dense<0.000000e+00> : vector<2x512xf32>
    %16 = tpu.matmul %15, %14, %cst_14 {dimension_numbers = #tpu.dot_dimension_numbers<[1], [0], [0], [1], [0, 0, 1, 1], [], []>} : vector<2x64xf32>, vector<64x512xf32>, vector<2x512xf32> -> vector<2x512xf32>
    %c0_15 = arith.constant 0 : index
    %c0_16 = arith.constant 0 : index
    %17 = vector.load %arg7[%c0_15, %c0_16] : memref<2x1xf32, #tpu.memory_space<vmem>>, vector<2x1xf32>
    %18 = vector.broadcast %17 : vector<2x1xf32> to vector<2x512xf32>
    %19 = arith.addf %16, %18 : vector<2x512xf32>
    %20 = tpu.iota {dimensions = array<i32: 0>} : vector<2x512xi32>
    %c0_i32 = arith.constant 0 : i32
    %21 = vector.broadcast %c0_i32 : i32 to vector<2x512xi32>
    %22 = arith.cmpi eq, %20, %21 : vector<2x512xi32>
    %23 = arith.negf %19 : vector<2x512xf32>
    %24 = math.exp %23 : vector<2x512xf32>
    %cst_17 = arith.constant 1.000000e+00 : f32
    %25 = vector.broadcast %cst_17 : f32 to vector<2x512xf32>
    %26 = arith.addf %25, %24 : vector<2x512xf32>
    %27 = arith.divf %25, %26 : vector<2x512xf32>
    %cst_18 = arith.constant 0.000000e+00 : f32
    %28 = vector.broadcast %cst_18 : f32 to vector<2x512xf32>
    %29 = arith.maximumf %19, %28 : vector<2x512xf32>
    %30 = vector.broadcast %cst_18 : f32 to vector<2x512xf32>
    %31 = arith.subf %19, %30 : vector<2x512xf32>
    %32 = arith.cmpf one, %31, %31 : vector<2x512xf32>
    %33 = vector.broadcast %cst_18 : f32 to vector<2x512xf32>
    %34 = arith.addf %19, %33 : vector<2x512xf32>
    %35 = math.absf %31 : vector<2x512xf32>
    %cst_19 = arith.constant 0.000000e+00 : f32
    %36 = vector.broadcast %cst_19 : f32 to vector<2x512xf32>
    %37 = arith.subf %36, %35 : vector<2x512xf32>
    %38 = math.exp %37 : vector<2x512xf32>
    %39 = math.log1p %38 : vector<2x512xf32>
    %40 = arith.addf %29, %39 : vector<2x512xf32>
    %41 = arith.select %32, %34, %40 : vector<2x512xi1>, vector<2x512xf32>
    %cst_20 = arith.constant 9.99999997E-7 : f32
    %42 = vector.broadcast %cst_20 : f32 to vector<2x512xf32>
    %43 = arith.addf %41, %42 : vector<2x512xf32>
    %44 = arith.select %22, %27, %43 : vector<2x512xi1>, vector<2x512xf32>
    %c0_21 = arith.constant 0 : index
    %c0_22 = arith.constant 0 : index
    %45 = vector.load %arg8[%c0_21, %c0_22] : memref<2x512xf32, #tpu.memory_space<vmem>>, vector<2x512xf32>
    tpu.vector_store %arg8[%c0_21, %c0_22], %44 {strides = array<i32>} : memref<2x512xf32, #tpu.memory_space<vmem>>, vector<2x512xf32>,
    return
  }
  func.func @transform_0(%arg0: i32) -> (i32, i32) {
    %c0_i32 = arith.constant 0 : i32
    %c0_i32_0 = arith.constant 0 : i32
    return %c0_i32, %arg0 : i32, i32
  }
  func.func @transform_1(%arg0: i32) -> (i32, i32) {
    %c0_i32 = arith.constant 0 : i32
    %c0_i32_0 = arith.constant 0 : i32
    %c0_i32_1 = arith.constant 0 : i32
    return %c0_i32, %c0_i32_0 : i32, i32
  }
  func.func @transform_2(%arg0: i32) -> (i32, i32) {
    %c0_i32 = arith.constant 0 : i32
    %c0_i32_0 = arith.constant 0 : i32
    %c0_i32_1 = arith.constant 0 : i32
    return %c0_i32, %c0_i32_0 : i32, i32
  }
  func.func @transform_3(%arg0: i32) -> (i32, i32) {
    %c0_i32 = arith.constant 0 : i32
    %c0_i32_0 = arith.constant 0 : i32
    %c0_i32_1 = arith.constant 0 : i32
    return %c0_i32, %c0_i32_0 : i32, i32
  }
  func.func @transform_4(%arg0: i32) -> (i32, i32) {
    %c0_i32 = arith.constant 0 : i32
    %c0_i32_0 = arith.constant 0 : i32
    %c0_i32_1 = arith.constant 0 : i32
    return %c0_i32, %c0_i32_0 : i32, i32
  }
  func.func @transform_5(%arg0: i32) -> (i32, i32) {
    %c0_i32 = arith.constant 0 : i32
    %c0_i32_0 = arith.constant 0 : i32
    %c0_i32_1 = arith.constant 0 : i32
    return %c0_i32, %c0_i32_0 : i32, i32
  }
  func.func @transform_6(%arg0: i32) -> (i32, i32) {
    %c0_i32 = arith.constant 0 : i32
    %c0_i32_0 = arith.constant 0 : i32
    %c0_i32_1 = arith.constant 0 : i32
    return %c0_i32, %c0_i32_0 : i32, i32
  }
  func.func @transform_7(%arg0: i32) -> (i32, i32) {
    %c0_i32 = arith.constant 0 : i32
    %c0_i32_0 = arith.constant 0 : i32
    return %c0_i32, %arg0 : i32, i32
  }
}

</mosaic_0001>

<bundles_post_ra>
// kernel: probabilistic_nn_forward.1
= control target key start
LH: loop header
LB: loop body
LE: loop exit
PB: predicated region body
PF: predicated region fallthrough
CT: control target
= control target key end

     0   :  { %v1408_v3 = vmov 0.0   ;;  %v1409_v8 = vmov 0   ;;  %vm170_vm0 = vcmask 523264   ;;  %s1831_s0 = inlined_call_operand.vmem [shape: f32[64,512], index: 0, kind: input, shape index: {}]   ;;  %s1832_s2 = inlined_call_operand.vmem [shape: f32[128,1], index: 2, kind: input, shape index: {}]   ;;  %s1833_s1 = inlined_call_operand.vmem [shape: f32[128,64], index: 1, kind: input, shape index: {}]   ;;  %s1834_s4 = inlined_call_operand.vmem [shape: f32[64,1], index: 4, kind: input, shape index: {}]   ;;  %s1835_s6 = inlined_call_operand.vmem [shape: f32[2,1], index: 6, kind: input, shape index: {}]   ;;  %s1836_s3 = inlined_call_operand.vmem [shape: f32[64,128], index: 3, kind: input, shape index: {}]   ;;  %s1837_s5 = inlined_call_operand.vmem [shape: f32[2,64], index: 5, kind: input, shape index: {}]   ;;  %s1838_s7 = inlined_call_operand.vmem [shape: f32[2,512], index: 7, kind: output, shape index: {}]  }
   0x1   :  { %v27_v0 = vld [vmem:[%s1831_s0 + $0x8] sm:$0xff]  ;;  %v29_v2 = vld [vmem:[%s1831_s0 + $0x18] sm:$0xff]  ;;  %283 = vmatprep.mubr.f32.mxu0 %v1408_v3  ;;  %444 = vmatprep.mubr.f32.mxu1 %v1408_v3  ;;  %v26_v6 = vld [vmem:[%s1831_s0] sm:$0xff] }
   0x2   :  { %v31_v1 = vld [vmem:[%s1831_s0 + $0x28] sm:$0xff]  ;;  %v33_v5 = vld [vmem:[%s1831_s0 + $0x38] sm:$0xff]  ;;  %v30_v7 = vld [vmem:[%s1831_s0 + $0x20] sm:$0xff]  ;;  %1374 = vset.pattern.permute.xlu0 %v1409_v8  ;;  %1375 = vset.pattern.permute.xlu1 %v1409_v8 }
   0x3   :  { %v1243_v4 = vpack.c.bf16 %v31_v1, %v27_v0  ;;  %v1259_v9 = vpack.c.bf16 %v33_v5, %v29_v2  ;;  %v1245_v10 = vpack.c.bf16 %v30_v7, %v26_v6  ;;  %v28_v11 = vld [vmem:[%s1831_s0 + $0x10] sm:$0xff]  ;;  %v35_v13 = vld [vmem:[%s1831_s0 + $0x48] sm:$0xff]  ;;  %v37_v16 = vld [vmem:[%s1831_s0 + $0x58] sm:$0xff] }
   0x4   :  { %v32_v12 = vld [vmem:[%s1831_s0 + $0x30] sm:$0xff]  ;;  %v39_v15 = vld [vmem:[%s1831_s0 + $0x68] sm:$0xff]  ;;  %v41_v17 = vld [vmem:[%s1831_s0 + $0x78] sm:$0xff] }
   0x5   :  { %1244 = vmatprep.subr.bf16.mxu0 %v1243_v4  ;;  %v1261_v14 = vpack.c.bf16 %v32_v12, %v28_v11  ;;  %1260 = vmatprep.subr.bf16.mxu1 %v1259_v9  ;;  %v1247_v18 = vpack.c.bf16 %v39_v15, %v35_v13  ;;  %v1263_v19 = vpack.c.bf16 %v41_v17, %v37_v16  ;;  %v34_v20 = vld [vmem:[%s1831_s0 + $0x40] sm:$0xff]  ;;  %v36_v22 = vld [vmem:[%s1831_s0 + $0x50] sm:$0xff]  ;;  %v43_v25 = vld [vmem:[%s1831_s0 + $0x88] sm:$0xff] }
   0x6   :  { %1246 = vmatpush1.bf16.msra.mxu0 %v1245_v10  ;;  %v38_v21 = vld [vmem:[%s1831_s0 + $0x60] sm:$0xff]  ;;  %v40_v24 = vld [vmem:[%s1831_s0 + $0x70] sm:$0xff]  ;;  %v47_v26 = vld [vmem:[%s1831_s0 + $0xa8] sm:$0xff] }
   0x7   :  { %1262 = vmatpush1.bf16.msra.mxu1 %v1261_v14  ;;  %v1249_v23 = vpack.c.bf16 %v38_v21, %v34_v20  ;;  %1248 = vmatprep.subr.bf16.mxu0 %v1247_v18  ;;  %v1265_v27 = vpack.c.bf16 %v40_v24, %v36_v22  ;;  %v1251_v28 = vpack.c.bf16 %v47_v26, %v43_v25  ;;  %v45_v29 = vld [vmem:[%s1831_s0 + $0x98] sm:$0xff]  ;;  %v42_v31 = vld [vmem:[%s1831_s0 + $0x80] sm:$0xff]  ;;  %v44_v34 = vld [vmem:[%s1831_s0 + $0x90] sm:$0xff] }
   0x8   :  { %1264 = vmatprep.subr.bf16.mxu1 %v1263_v19  ;;  %v49_v30 = vld [vmem:[%s1831_s0 + $0xb8] sm:$0xff]  ;;  %v46_v33 = vld [vmem:[%s1831_s0 + $0xa0] sm:$0xff]  ;;  %v48_v35 = vld [vmem:[%s1831_s0 + $0xb0] sm:$0xff] }
   0x9   :  { %v1267_v32 = vpack.c.bf16 %v49_v30, %v45_v29  ;;  %v1253_v36 = vpack.c.bf16 %v46_v33, %v42_v31  ;;  %v51_v37 = vld [vmem:[%s1831_s0 + $0xc8] sm:$0xff]  ;;  %v53_v39 = vld [vmem:[%s1831_s0 + $0xd8] sm:$0xff]  ;;  %v1269_v40 = vpack.c.bf16 %v48_v35, %v44_v34  ;;  %v50_v43 = vld [vmem:[%s1831_s0 + $0xc0] sm:$0xff] }
   0xa   :  { %1250 = vmatpush1.bf16.msra.mxu0 %v1249_v23  ;;  %v55_v38 = vld [vmem:[%s1831_s0 + $0xe8] sm:$0xff]  ;;  %v57_v42 = vld [vmem:[%s1831_s0 + $0xf8] sm:$0xff]  ;;  %v54_v44 = vld [vmem:[%s1831_s0 + $0xe0] sm:$0xff] }
   0xb   :  { %1266 = vmatpush1.bf16.msra.mxu1 %v1265_v27  ;;  %1252 = vmatprep.subr.bf16.mxu0 %v1251_v28  ;;  %v1255_v41 = vpack.c.bf16 %v55_v38, %v51_v37  ;;  %v1271_v45 = vpack.c.bf16 %v57_v42, %v53_v39  ;;  %v52_v46 = vld [vmem:[%s1831_s0 + $0xd0] sm:$0xff]  ;;  %v1257_v48 = vpack.c.bf16 %v54_v44, %v50_v43  ;;  %v74_v50 = vld [vmem:[%s1832_s2] sm:$0xff]  ;;  %v75_v52 = vld [vmem:[%s1832_s2 + $0x8] sm:$0xff] }
   0xc   :  { %1268 = vmatprep.subr.bf16.mxu1 %v1267_v32  ;;  %v56_v47 = vld [vmem:[%s1831_s0 + $0xf0] sm:$0xff]  ;;  %92 = vperm.xlu0 %1374, %v74_v50   ;;  %v58_v51 = vld [vmem:[%s1833_s1] sm:$0xff]  ;;  %v77_v54 = vld [vmem:[%s1832_s2 + $0x18] sm:$0xff] }
   0xd   :  { %v1273_v49 = vpack.c.bf16 %v56_v47, %v52_v46  ;;  %v76_v53 = vld [vmem:[%s1832_s2 + $0x10] sm:$0xff]  ;;  %v59_v55 = vld [vmem:[%s1833_s1 + $0x8] sm:$0xff]  ;;  %v78_v56 = vld [vmem:[%s1832_s2 + $0x20] sm:$0xff] }
   0xe   :  { %1254 = vmatpush1.bf16.msra.mxu0 %v1253_v36  ;;  %102 = vperm.xlu1 %1375, %v76_v53   ;;  %v79_v57 = vld [vmem:[%s1832_s2 + $0x28] sm:$0xff]  ;;  %v60_v58 = vld [vmem:[%s1833_s1 + $0x10] sm:$0xff]  ;;  %v81_v60 = vld [vmem:[%s1832_s2 + $0x38] sm:$0xff] }
   0xf   :  { %1270 = vmatpush1.bf16.msra.mxu1 %v1269_v40  ;;  %1256 = vmatprep.subr.bf16.mxu0 %v1255_v41  ;;  %v80_v59 = vld [vmem:[%s1832_s2 + $0x30] sm:$0xff]  ;;  %v61_v61 = vld [vmem:[%s1833_s1 + $0x18] sm:$0xff]  ;;  %v82_v62 = vld [vmem:[%s1832_s2 + $0x40] sm:$0xff] }
  0x10   :  { %1272 = vmatprep.subr.bf16.mxu1 %v1271_v45  ;;  %97 = vperm.xlu0 %1374, %v75_v52   ;;  %v83_v63 = vld [vmem:[%s1832_s2 + $0x48] sm:$0xff]  ;;  %v62_v0 = vld [vmem:[%s1833_s1 + $0x20] sm:$0xff]  ;;  %v84_v1 = vld [vmem:[%s1832_s2 + $0x50] sm:$0xff] }
  0x11   :  { %v85_v2 = vld [vmem:[%s1832_s2 + $0x58] sm:$0xff]  ;;  %v63_v4 = vld [vmem:[%s1833_s1 + $0x28] sm:$0xff]  ;;  %v86_v5 = vld [vmem:[%s1832_s2 + $0x60] sm:$0xff] }
  0x12   :  { %1258 = vmatpush1.bf16.msra.mxu0 %v1257_v48  ;;  %107 = vperm.xlu1 %1375, %v77_v54   ;;  %v87_v6 = vld [vmem:[%s1832_s2 + $0x68] sm:$0xff]  ;;  %v64_v7 = vld [vmem:[%s1833_s1 + $0x30] sm:$0xff]  ;;  %v89_v9 = vld [vmem:[%s1832_s2 + $0x78] sm:$0xff] }
  0x13   :  { %1274 = vmatpush1.bf16.msra.mxu1 %v1273_v49  ;;  %v88_v8 = vld [vmem:[%s1832_s2 + $0x70] sm:$0xff]  ;;  %v65_v10 = vld [vmem:[%s1833_s1 + $0x38] sm:$0xff]  ;;  %v613_v11 = vld [vmem:[%s1834_s4] sm:$0xff] }
  0x14   :  { %112 = vperm.xlu0 %1374, %v78_v56   ;;  %v614_v12 = vld [vmem:[%s1834_s4 + $0x8] sm:$0xff]  ;;  %v66_v13 = vld [vmem:[%s1833_s1 + $0x40] sm:$0xff]  ;;  %v615_v14 = vld [vmem:[%s1834_s4 + $0x10] sm:$0xff] }
  0x15   :  { %1205 = vmatmul.mubr.msk.f32.vlgmr.msra.gmra.mrb[0].mxu0 %vm170_vm0, %v58_v51  ;;  %v616_v15 = vld [vmem:[%s1834_s4 + $0x18] sm:$0xff]  ;;  %v67_v16 = vld [vmem:[%s1833_s1 + $0x48] sm:$0xff]  ;;  %v617_v17 = vld [vmem:[%s1834_s4 + $0x20] sm:$0xff] }
  0x16   :  { %1221 = vmatmul.mubr.msk.f32.vlgmr.msra.gmra.mrb[0].mxu1 %vm170_vm0, %v58_v51  ;;  %289 = vmatprep.mubr.f32.mxu0 %v1408_v3  ;;  %v618_v18 = vld [vmem:[%s1834_s4 + $0x28] sm:$0xff]  ;;  %v68_v19 = vld [vmem:[%s1833_s1 + $0x50] sm:$0xff]  ;;  %v620_v21 = vld [vmem:[%s1834_s4 + $0x38] sm:$0xff] }
  0x17   :  { %450 = vmatprep.mubr.f32.mxu1 %v1408_v3  ;;  %117 = vperm.xlu1 %1375, %v79_v57   ;;  %v619_v20 = vld [vmem:[%s1834_s4 + $0x30] sm:$0xff]  ;;  %v69_v22 = vld [vmem:[%s1833_s1 + $0x58] sm:$0xff]  ;;  %v920_v23 = vld [vmem:[%s1835_s6] sm:$0x3] }
  0x18   :  { %122 = vperm.xlu0 %1374, %v80_v59   ;;  %v70_v24 = vld [vmem:[%s1833_s1 + $0x60] sm:$0xff]  ;;  %v71_v25 = vld [vmem:[%s1833_s1 + $0x68] sm:$0xff]  ;;  %v72_v26 = vld [vmem:[%s1833_s1 + $0x70] sm:$0xff] }
  0x19   :  { %1206 = vmatmul.mubr.msk.f32.gmra.mrb[2].mxu0 %vm170_vm0, %v59_v55  ;;  %v73_v27 = vld [vmem:[%s1833_s1 + $0x78] sm:$0xff] }
  0x1a   :  { %1222 = vmatmul.mubr.msk.f32.gmra.mrb[2].mxu1 %vm170_vm0, %v59_v55  ;;  %295 = vmatprep.mubr.f32.mxu0 %v1408_v3 }
  0x1b   :  { %456 = vmatprep.mubr.f32.mxu1 %v1408_v3  ;;  %127 = vperm.xlu1 %1375, %v81_v60  }
  0x1c   :  { %132 = vperm.xlu0 %1374, %v82_v62  }
  0x1d   :  { %1207 = vmatmul.mubr.msk.f32.gmra.mrb[4].mxu0 %vm170_vm0, %v60_v58 }
  0x1e   :  { %1223 = vmatmul.mubr.msk.f32.gmra.mrb[4].mxu1 %vm170_vm0, %v60_v58  ;;  %301 = vmatprep.mubr.f32.mxu0 %v1408_v3 }
  0x1f   :  { %462 = vmatprep.mubr.f32.mxu1 %v1408_v3  ;;  %137 = vperm.xlu1 %1375, %v83_v63  }
  0x20   :  { %142 = vperm.xlu0 %1374, %v84_v1  }
  0x21   :  { %1208 = vmatmul.mubr.msk.f32.gmra.mrb[6].mxu0 %vm170_vm0, %v61_v61 }
  0x22   :  { %1224 = vmatmul.mubr.msk.f32.gmra.mrb[6].mxu1 %vm170_vm0, %v61_v61  ;;  %307 = vmatprep.mubr.f32.mxu0 %v1408_v3 }
  0x23   :  { %468 = vmatprep.mubr.f32.mxu1 %v1408_v3  ;;  %147 = vperm.xlu1 %1375, %v85_v2  }
  0x24   :  { %152 = vperm.xlu0 %1374, %v86_v5  }
  0x25   :  { %1209 = vmatmul.mubr.msk.f32.gmra.mrb[8].mxu0 %vm170_vm0, %v62_v0 }
  0x26   :  { %1225 = vmatmul.mubr.msk.f32.gmra.mrb[8].mxu1 %vm170_vm0, %v62_v0  ;;  %313 = vmatprep.mubr.f32.mxu0 %v1408_v3 }
  0x27   :  { %474 = vmatprep.mubr.f32.mxu1 %v1408_v3  ;;  %157 = vperm.xlu1 %1375, %v87_v6  }
  0x28   :  { %162 = vperm.xlu0 %1374, %v88_v8  }
  0x29   :  { %1210 = vmatmul.mubr.msk.f32.gmra.mrb[10].mxu0 %vm170_vm0, %v63_v4 }
  0x2a   :  { %1226 = vmatmul.mubr.msk.f32.gmra.mrb[10].mxu1 %vm170_vm0, %v63_v4  ;;  %319 = vmatprep.mubr.f32.mxu0 %v1408_v3 }
  0x2b   :  { %480 = vmatprep.mubr.f32.mxu1 %v1408_v3  ;;  %167 = vperm.xlu1 %1375, %v89_v9  }
  0x2c   :  { %623 = vperm.xlu0 %1374, %v613_v11  }
  0x2d   :  { %1211 = vmatmul.mubr.msk.f32.gmra.mrb[12].mxu0 %vm170_vm0, %v64_v7 }
  0x2e   :  { %1227 = vmatmul.mubr.msk.f32.gmra.mrb[12].mxu1 %vm170_vm0, %v64_v7  ;;  %325 = vmatprep.mubr.f32.mxu0 %v1408_v3 }
  0x2f   :  { %486 = vmatprep.mubr.f32.mxu1 %v1408_v3  ;;  %628 = vperm.xlu1 %1375, %v614_v12  }
  0x30   :  { %633 = vperm.xlu0 %1374, %v615_v14  }
  0x31   :  { %1212 = vmatmul.mubr.msk.f32.gmra.mrb[14].mxu0 %vm170_vm0, %v65_v10 }
  0x32   :  { %1228 = vmatmul.mubr.msk.f32.gmra.mrb[14].mxu1 %vm170_vm0, %v65_v10  ;;  %331 = vmatprep.mubr.f32.mxu0 %v1408_v3 }
  0x33   :  { %492 = vmatprep.mubr.f32.mxu1 %v1408_v3  ;;  %638 = vperm.xlu1 %1375, %v616_v15  }
  0x34   :  { %643 = vperm.xlu0 %1374, %v617_v17  }
  0x35   :  { %1213 = vmatmul.mubr.msk.f32.gmra.mrb[16].mxu0 %vm170_vm0, %v66_v13 }
  0x36   :  { %1229 = vmatmul.mubr.msk.f32.gmra.mrb[16].mxu1 %vm170_vm0, %v66_v13  ;;  %337 = vmatprep.mubr.f32.mxu0 %v1408_v3 }
  0x37   :  { %498 = vmatprep.mubr.f32.mxu1 %v1408_v3  ;;  %648 = vperm.xlu1 %1375, %v618_v18  }
  0x38   :  { %653 = vperm.xlu0 %1374, %v619_v20  }
  0x39   :  { %1214 = vmatmul.mubr.msk.f32.gmra.mrb[18].mxu0 %vm170_vm0, %v67_v16 }
  0x3a   :  { %1230 = vmatmul.mubr.msk.f32.gmra.mrb[18].mxu1 %vm170_vm0, %v67_v16  ;;  %343 = vmatprep.mubr.f32.mxu0 %v1408_v3 }
  0x3b   :  { %504 = vmatprep.mubr.f32.mxu1 %v1408_v3  ;;  %658 = vperm.xlu1 %1375, %v620_v21  }
  0x3c   :  { %923 = vperm.xlu0 %1374, %v920_v23  }
  0x3d   :  { %1215 = vmatmul.mubr.msk.f32.gmra.mrb[20].mxu0 %vm170_vm0, %v68_v19 }
  0x3e   :  { %1231 = vmatmul.mubr.msk.f32.gmra.mrb[20].mxu1 %vm170_vm0, %v68_v19  ;;  %349 = vmatprep.mubr.f32.mxu0 %v1408_v3 }
  0x3f   :  { %510 = vmatprep.mubr.f32.mxu1 %v1408_v3 }
  0x41   :  { %1216 = vmatmul.mubr.msk.f32.gmra.mrb[22].mxu0 %vm170_vm0, %v69_v22 }
  0x42   :  { %1232 = vmatmul.mubr.msk.f32.gmra.mrb[22].mxu1 %vm170_vm0, %v69_v22  ;;  %355 = vmatprep.mubr.f32.mxu0 %v1408_v3 }
  0x43   :  { %516 = vmatprep.mubr.f32.mxu1 %v1408_v3 }
  0x45   :  { %1217 = vmatmul.mubr.msk.f32.gmra.mrb[24].mxu0 %vm170_vm0, %v70_v24 }
  0x46   :  { %1233 = vmatmul.mubr.msk.f32.gmra.mrb[24].mxu1 %vm170_vm0, %v70_v24  ;;  %361 = vmatprep.mubr.f32.mxu0 %v1408_v3 }
  0x47   :  { %522 = vmatprep.mubr.f32.mxu1 %v1408_v3 }
  0x49   :  { %1218 = vmatmul.mubr.msk.f32.gmra.mrb[26].mxu0 %vm170_vm0, %v71_v25 }
  0x4a   :  { %1234 = vmatmul.mubr.msk.f32.gmra.mrb[26].mxu1 %vm170_vm0, %v71_v25  ;;  %367 = vmatprep.mubr.f32.mxu0 %v1408_v3 }
  0x4b   :  { %528 = vmatprep.mubr.f32.mxu1 %v1408_v3 }
  0x4d   :  { %1219 = vmatmul.mubr.msk.f32.gmra.mrb[28].mxu0 %vm170_vm0, %v72_v26 }
  0x4e   :  { %1235 = vmatmul.mubr.msk.f32.gmra.mrb[28].mxu1 %vm170_vm0, %v72_v26  ;;  %373 = vmatprep.mubr.f32.mxu0 %v1408_v3 }
  0x4f   :  { %534 = vmatprep.mubr.f32.mxu1 %v1408_v3 }
  0x51   :  { %1220 = vmatmul.mubr.msk.f32.gmra.mrb[30].mxu0 %vm170_vm0, %v73_v27 }
  0x52   :  { %1236 = vmatmul.mubr.msk.f32.gmra.mrb[30].mxu1 %vm170_vm0, %v73_v27  ;;  %725 = vmatprep.mubr.f32.mxu0 %v1408_v3 }
  0x53   :  { %838 = vmatprep.mubr.f32.mxu1 %v1408_v3 }
  0x8b   :  { %v93_v28 = vpop.permute.xlu0 %92 }
  0x8d   :  { %v103_v42 = vpop.permute.xlu1 %102 }
  0x8f   :  { %v98_v34 = vpop.permute.xlu0 %97 }
  0x91   :  { %v108_v0 = vpop.permute.xlu1 %107 }
  0x93   :  { %v113_v25 = vpop.permute.xlu0 %112 }
  0xe8   :  { %v285_v29 = vpop.f32.mrb[0].mxu0 }
  0xe9   :  { %v446_v30 = vpop.f32.mrb[0].mxu1  ;;  %v287_v31 = vpop.f32.mrb[1].mxu0  ;;  %v286_v33 = vadd.f32 %v285_v29, %v93_v28 }
  0xea   :  { %v448_v32 = vpop.f32.mrb[1].mxu1  ;;  %v447_v35 = vadd.f32 %v446_v30, %v93_v28  ;;  %v288_v36 = vadd.f32 %v287_v31, %v93_v28  ;;  %v118_v31 = vpop.permute.xlu1 %117 }
  0xeb   :  { %v449_v38 = vadd.f32 %v448_v32, %v93_v28  ;;  %v541_v46 = vmax.f32 %v286_v33, 0.0 }
  0xec   :  { %v291_v37 = vpop.f32.mrb[2].mxu0  ;;  %v543_v49 = vmax.f32 %v447_v35, 0.0  ;;  %v542_v50 = vmax.f32 %v288_v36, 0.0 }
  0xed   :  { %v292_v39 = vadd.f32 %v291_v37, %v98_v34  ;;  %v452_v40 = vpop.f32.mrb[2].mxu1  ;;  %v293_v41 = vpop.f32.mrb[3].mxu0  ;;  %v544_v54 = vmax.f32 %v449_v38, 0.0 }
  0xee   :  { %v453_v43 = vadd.f32 %v452_v40, %v98_v34  ;;  %v294_v44 = vadd.f32 %v293_v41, %v98_v34  ;;  %v454_v45 = vpop.f32.mrb[3].mxu1 }
  0xef   :  { %v545_v47 = vmax.f32 %v292_v39, 0.0  ;;  %v455_v48 = vadd.f32 %v454_v45, %v98_v34 }
  0xf0   :  { %v547_v51 = vmax.f32 %v453_v43, 0.0  ;;  %v546_v52 = vmax.f32 %v294_v44, 0.0  ;;  %v297_v53 = vpop.f32.mrb[4].mxu0 }
  0xf1   :  { %v1277_v55 = vpack.c.bf16 %v545_v47, %v541_v46  ;;  %v548_v56 = vmax.f32 %v455_v48, 0.0  ;;  %v458_v57 = vpop.f32.mrb[4].mxu1  ;;  %v299_v58 = vpop.f32.mrb[5].mxu0  ;;  %v298_v63 = vadd.f32 %v297_v53, %v103_v42 }
  0xf2   :  { %v1309_v59 = vpack.c.bf16 %v547_v51, %v543_v49  ;;  %v1275_v60 = vpack.c.bf16 %v546_v52, %v542_v50  ;;  %v460_v61 = vpop.f32.mrb[5].mxu1  ;;  %v459_v1 = vadd.f32 %v458_v57, %v103_v42  ;;  %v300_v2 = vadd.f32 %v299_v58, %v103_v42 }
  0xf3   :  { %v1307_v62 = vpack.c.bf16 %v548_v56, %v544_v54  ;;  %v461_v5 = vadd.f32 %v460_v61, %v103_v42  ;;  %v549_v12 = vmax.f32 %v298_v63, 0.0  ;;  %v128_v61 = vpop.permute.xlu1 %127 }
  0xf4   :  { %v303_v4 = vpop.f32.mrb[6].mxu0  ;;  %1276 = vmatprep.subr.bf16.mxu0 %v1275_v60  ;;  %v551_v15 = vmax.f32 %v459_v1, 0.0  ;;  %v550_v16 = vmax.f32 %v300_v2, 0.0 }
  0xf5   :  { %v304_v6 = vadd.f32 %v303_v4, %v108_v0  ;;  %v464_v7 = vpop.f32.mrb[6].mxu1  ;;  %1308 = vmatprep.subr.bf16.mxu1 %v1307_v62  ;;  %v305_v8 = vpop.f32.mrb[7].mxu0  ;;  %1278 = vmatpush1.bf16.msra.mxu0 %v1277_v55  ;;  %v552_v20 = vmax.f32 %v461_v5, 0.0 }
  0xf6   :  { %v465_v9 = vadd.f32 %v464_v7, %v108_v0  ;;  %v306_v10 = vadd.f32 %v305_v8, %v108_v0  ;;  %v466_v11 = vpop.f32.mrb[7].mxu1  ;;  %1310 = vmatpush1.bf16.msra.mxu1 %v1309_v59  ;;  %v123_v55 = vpop.permute.xlu0 %122 }
  0xf7   :  { %v553_v13 = vmax.f32 %v304_v6, 0.0  ;;  %v467_v14 = vadd.f32 %v466_v11, %v108_v0 }
  0xf8   :  { %v555_v17 = vmax.f32 %v465_v9, 0.0  ;;  %v554_v18 = vmax.f32 %v306_v10, 0.0  ;;  %v309_v19 = vpop.f32.mrb[8].mxu0 }
  0xf9   :  { %v1281_v21 = vpack.c.bf16 %v553_v13, %v549_v12  ;;  %v556_v22 = vmax.f32 %v467_v14, 0.0  ;;  %v470_v23 = vpop.f32.mrb[8].mxu1  ;;  %v311_v24 = vpop.f32.mrb[9].mxu0  ;;  %v310_v30 = vadd.f32 %v309_v19, %v113_v25 }
  0xfa   :  { %v1313_v26 = vpack.c.bf16 %v555_v17, %v551_v15  ;;  %v1279_v27 = vpack.c.bf16 %v554_v18, %v550_v16  ;;  %v472_v28 = vpop.f32.mrb[9].mxu1  ;;  %v471_v32 = vadd.f32 %v470_v23, %v113_v25  ;;  %v312_v33 = vadd.f32 %v311_v24, %v113_v25 }
  0xfb   :  { %v1311_v29 = vpack.c.bf16 %v556_v22, %v552_v20  ;;  %v473_v35 = vadd.f32 %v472_v28, %v113_v25  ;;  %v557_v42 = vmax.f32 %v310_v30, 0.0  ;;  %v133_v22 = vpop.permute.xlu0 %132  ;;  %v138_v28 = vpop.permute.xlu1 %137 }
  0xfc   :  { %v315_v34 = vpop.f32.mrb[10].mxu0  ;;  %1280 = vmatprep.subr.bf16.mxu0 %v1279_v27  ;;  %v559_v45 = vmax.f32 %v471_v32, 0.0  ;;  %v558_v46 = vmax.f32 %v312_v33, 0.0 }
  0xfd   :  { %v316_v36 = vadd.f32 %v315_v34, %v118_v31  ;;  %v476_v37 = vpop.f32.mrb[10].mxu1  ;;  %1312 = vmatprep.subr.bf16.mxu1 %v1311_v29  ;;  %v317_v38 = vpop.f32.mrb[11].mxu0  ;;  %1282 = vmatpush1.bf16.msra.mxu0 %v1281_v21  ;;  %v560_v50 = vmax.f32 %v473_v35, 0.0 }
  0xfe   :  { %v477_v39 = vadd.f32 %v476_v37, %v118_v31  ;;  %v318_v40 = vadd.f32 %v317_v38, %v118_v31  ;;  %v478_v41 = vpop.f32.mrb[11].mxu1  ;;  %1314 = vmatpush1.bf16.msra.mxu1 %v1313_v26 }
  0xff   :  { %v561_v43 = vmax.f32 %v316_v36, 0.0  ;;  %v479_v44 = vadd.f32 %v478_v41, %v118_v31 }
 0x100   :  { %v563_v47 = vmax.f32 %v477_v39, 0.0  ;;  %v562_v48 = vmax.f32 %v318_v40, 0.0  ;;  %v321_v49 = vpop.f32.mrb[12].mxu0 }
 0x101   :  { %v1285_v51 = vpack.c.bf16 %v561_v43, %v557_v42  ;;  %v564_v52 = vmax.f32 %v479_v44, 0.0  ;;  %v482_v53 = vpop.f32.mrb[12].mxu1  ;;  %v323_v54 = vpop.f32.mrb[13].mxu0  ;;  %v322_v60 = vadd.f32 %v321_v49, %v123_v55 }
 0x102   :  { %v1317_v56 = vpack.c.bf16 %v563_v47, %v559_v45  ;;  %v1283_v57 = vpack.c.bf16 %v562_v48, %v558_v46  ;;  %v484_v58 = vpop.f32.mrb[13].mxu1  ;;  %v483_v62 = vadd.f32 %v482_v53, %v123_v55  ;;  %v324_v63 = vadd.f32 %v323_v54, %v123_v55 }
 0x103   :  { %v1315_v59 = vpack.c.bf16 %v564_v52, %v560_v50  ;;  %v485_v1 = vadd.f32 %v484_v58, %v123_v55  ;;  %v565_v9 = vmax.f32 %v322_v60, 0.0  ;;  %v143_v52 = vpop.permute.xlu0 %142  ;;  %v148_v58 = vpop.permute.xlu1 %147 }
 0x104   :  { %v327_v0 = vpop.f32.mrb[14].mxu0  ;;  %1284 = vmatprep.subr.bf16.mxu0 %v1283_v57  ;;  %v567_v12 = vmax.f32 %v483_v62, 0.0  ;;  %v566_v13 = vmax.f32 %v324_v63, 0.0 }
 0x105   :  { %v328_v2 = vadd.f32 %v327_v0, %v128_v61  ;;  %v488_v4 = vpop.f32.mrb[14].mxu1  ;;  %1316 = vmatprep.subr.bf16.mxu1 %v1315_v59  ;;  %v329_v5 = vpop.f32.mrb[15].mxu0  ;;  %1286 = vmatpush1.bf16.msra.mxu0 %v1285_v51  ;;  %v568_v17 = vmax.f32 %v485_v1, 0.0 }
 0x106   :  { %v489_v6 = vadd.f32 %v488_v4, %v128_v61  ;;  %v330_v7 = vadd.f32 %v329_v5, %v128_v61  ;;  %v490_v8 = vpop.f32.mrb[15].mxu1  ;;  %1318 = vmatpush1.bf16.msra.mxu1 %v1317_v56 }
 0x107   :  { %v569_v10 = vmax.f32 %v328_v2, 0.0  ;;  %v491_v11 = vadd.f32 %v490_v8, %v128_v61 }
 0x108   :  { %v571_v14 = vmax.f32 %v489_v6, 0.0  ;;  %v570_v15 = vmax.f32 %v330_v7, 0.0  ;;  %v333_v16 = vpop.f32.mrb[16].mxu0 }
 0x109   :  { %v1289_v18 = vpack.c.bf16 %v569_v10, %v565_v9  ;;  %v572_v19 = vmax.f32 %v491_v11, 0.0  ;;  %v494_v20 = vpop.f32.mrb[16].mxu1  ;;  %v335_v21 = vpop.f32.mrb[17].mxu0  ;;  %v334_v27 = vadd.f32 %v333_v16, %v133_v22 }
 0x10a   :  { %v1321_v23 = vpack.c.bf16 %v571_v14, %v567_v12  ;;  %v1287_v24 = vpack.c.bf16 %v570_v15, %v566_v13  ;;  %v496_v25 = vpop.f32.mrb[17].mxu1  ;;  %v495_v29 = vadd.f32 %v494_v20, %v133_v22  ;;  %v336_v30 = vadd.f32 %v335_v21, %v133_v22 }
 0x10b   :  { %v1319_v26 = vpack.c.bf16 %v572_v19, %v568_v17  ;;  %v497_v32 = vadd.f32 %v496_v25, %v133_v22  ;;  %v573_v39 = vmax.f32 %v334_v27, 0.0  ;;  %v153_v19 = vpop.permute.xlu0 %152  ;;  %v158_v25 = vpop.permute.xlu1 %157 }
 0x10c   :  { %v339_v31 = vpop.f32.mrb[18].mxu0  ;;  %1288 = vmatprep.subr.bf16.mxu0 %v1287_v24  ;;  %v575_v42 = vmax.f32 %v495_v29, 0.0  ;;  %v574_v43 = vmax.f32 %v336_v30, 0.0 }
 0x10d   :  { %v340_v33 = vadd.f32 %v339_v31, %v138_v28  ;;  %v500_v34 = vpop.f32.mrb[18].mxu1  ;;  %1320 = vmatprep.subr.bf16.mxu1 %v1319_v26  ;;  %v341_v35 = vpop.f32.mrb[19].mxu0  ;;  %1290 = vmatpush1.bf16.msra.mxu0 %v1289_v18  ;;  %v576_v47 = vmax.f32 %v497_v32, 0.0 }
 0x10e   :  { %v501_v36 = vadd.f32 %v500_v34, %v138_v28  ;;  %v342_v37 = vadd.f32 %v341_v35, %v138_v28  ;;  %v502_v38 = vpop.f32.mrb[19].mxu1  ;;  %1322 = vmatpush1.bf16.msra.mxu1 %v1321_v23 }
 0x10f   :  { %v577_v40 = vmax.f32 %v340_v33, 0.0  ;;  %v503_v41 = vadd.f32 %v502_v38, %v138_v28 }
 0x110   :  { %v579_v44 = vmax.f32 %v501_v36, 0.0  ;;  %v578_v45 = vmax.f32 %v342_v37, 0.0  ;;  %v345_v46 = vpop.f32.mrb[20].mxu0 }
 0x111   :  { %v1293_v48 = vpack.c.bf16 %v577_v40, %v573_v39  ;;  %v580_v49 = vmax.f32 %v503_v41, 0.0  ;;  %v506_v50 = vpop.f32.mrb[20].mxu1  ;;  %v347_v51 = vpop.f32.mrb[21].mxu0  ;;  %v346_v57 = vadd.f32 %v345_v46, %v143_v52 }
 0x112   :  { %v1325_v53 = vpack.c.bf16 %v579_v44, %v575_v42  ;;  %v1291_v54 = vpack.c.bf16 %v578_v45, %v574_v43  ;;  %v508_v55 = vpop.f32.mrb[21].mxu1  ;;  %v507_v59 = vadd.f32 %v506_v50, %v143_v52  ;;  %v348_v60 = vadd.f32 %v347_v51, %v143_v52 }
 0x113   :  { %v1323_v56 = vpack.c.bf16 %v580_v49, %v576_v47  ;;  %v509_v62 = vadd.f32 %v508_v55, %v143_v52  ;;  %v581_v6 = vmax.f32 %v346_v57, 0.0  ;;  %v163_v49 = vpop.permute.xlu0 %162  ;;  %v168_v55 = vpop.permute.xlu1 %167 }
 0x114   :  { %v351_v61 = vpop.f32.mrb[22].mxu0  ;;  %1292 = vmatprep.subr.bf16.mxu0 %v1291_v54  ;;  %v583_v9 = vmax.f32 %v507_v59, 0.0  ;;  %v582_v10 = vmax.f32 %v348_v60, 0.0 }
 0x115   :  { %v352_v63 = vadd.f32 %v351_v61, %v148_v58  ;;  %v512_v0 = vpop.f32.mrb[22].mxu1  ;;  %1324 = vmatprep.subr.bf16.mxu1 %v1323_v56  ;;  %v353_v1 = vpop.f32.mrb[23].mxu0  ;;  %1294 = vmatpush1.bf16.msra.mxu0 %v1293_v48  ;;  %v584_v14 = vmax.f32 %v509_v62, 0.0 }
 0x116   :  { %v513_v2 = vadd.f32 %v512_v0, %v148_v58  ;;  %v354_v4 = vadd.f32 %v353_v1, %v148_v58  ;;  %v514_v5 = vpop.f32.mrb[23].mxu1  ;;  %1326 = vmatpush1.bf16.msra.mxu1 %v1325_v53 }
 0x117   :  { %v585_v7 = vmax.f32 %v352_v63, 0.0  ;;  %v515_v8 = vadd.f32 %v514_v5, %v148_v58 }
 0x118   :  { %v587_v11 = vmax.f32 %v513_v2, 0.0  ;;  %v586_v12 = vmax.f32 %v354_v4, 0.0  ;;  %v357_v13 = vpop.f32.mrb[24].mxu0 }
 0x119   :  { %v1297_v15 = vpack.c.bf16 %v585_v7, %v581_v6  ;;  %v588_v16 = vmax.f32 %v515_v8, 0.0  ;;  %v518_v17 = vpop.f32.mrb[24].mxu1  ;;  %v359_v18 = vpop.f32.mrb[25].mxu0  ;;  %v358_v24 = vadd.f32 %v357_v13, %v153_v19 }
 0x11a   :  { %v1329_v20 = vpack.c.bf16 %v587_v11, %v583_v9  ;;  %v1295_v21 = vpack.c.bf16 %v586_v12, %v582_v10  ;;  %v520_v22 = vpop.f32.mrb[25].mxu1  ;;  %v519_v26 = vadd.f32 %v518_v17, %v153_v19  ;;  %v360_v27 = vadd.f32 %v359_v18, %v153_v19  ;;  %v606_v17 = vld [vmem:[%s1836_s3 + $0x8] sm:$0xff]  ;;  %v607_v18 = vld [vmem:[%s1836_s3 + $0x10] sm:$0xff] }
 0x11b   :  { %v1327_v23 = vpack.c.bf16 %v588_v16, %v584_v14  ;;  %v521_v29 = vadd.f32 %v520_v22, %v153_v19  ;;  %v589_v36 = vmax.f32 %v358_v24, 0.0  ;;  %v605_v16 = vld [vmem:[%s1836_s3] sm:$0xff]  ;;  %v608_v19 = vld [vmem:[%s1836_s3 + $0x18] sm:$0xff]  ;;  %v611_v22 = vld [vmem:[%s1836_s3 + $0x30] sm:$0xff] }
 0x11c   :  { %v363_v28 = vpop.f32.mrb[26].mxu0  ;;  %1296 = vmatprep.subr.bf16.mxu0 %v1295_v21  ;;  %v591_v39 = vmax.f32 %v519_v26, 0.0  ;;  %v590_v40 = vmax.f32 %v360_v27, 0.0  ;;  %v610_v21 = vld [vmem:[%s1836_s3 + $0x28] sm:$0xff]  ;;  %v624_v27 = vpop.permute.xlu0 %623 }
 0x11d   :  { %v364_v30 = vadd.f32 %v363_v28, %v158_v25  ;;  %v524_v31 = vpop.f32.mrb[26].mxu1  ;;  %1328 = vmatprep.subr.bf16.mxu1 %v1327_v23  ;;  %v365_v32 = vpop.f32.mrb[27].mxu0  ;;  %1298 = vmatpush1.bf16.msra.mxu0 %v1297_v15  ;;  %v592_v44 = vmax.f32 %v521_v29, 0.0  ;;  %v612_v23 = vld [vmem:[%s1836_s3 + $0x38] sm:$0xff] }
 0x11e   :  { %v525_v33 = vadd.f32 %v524_v31, %v158_v25  ;;  %v366_v34 = vadd.f32 %v365_v32, %v158_v25  ;;  %v526_v35 = vpop.f32.mrb[27].mxu1  ;;  %1330 = vmatpush1.bf16.msra.mxu1 %v1329_v20  ;;  %v609_v20 = vld [vmem:[%s1836_s3 + $0x20] sm:$0xff] }
 0x11f   :  { %v593_v37 = vmax.f32 %v364_v30, 0.0  ;;  %v527_v38 = vadd.f32 %v526_v35, %v158_v25  ;;  %v629_v30 = vpop.permute.xlu1 %628 }
 0x120   :  { %v595_v41 = vmax.f32 %v525_v33, 0.0  ;;  %v594_v42 = vmax.f32 %v366_v34, 0.0  ;;  %v369_v43 = vpop.f32.mrb[28].mxu0 }
 0x121   :  { %v1301_v45 = vpack.c.bf16 %v593_v37, %v589_v36  ;;  %v596_v46 = vmax.f32 %v527_v38, 0.0  ;;  %v530_v47 = vpop.f32.mrb[28].mxu1  ;;  %v371_v48 = vpop.f32.mrb[29].mxu0  ;;  %v370_v54 = vadd.f32 %v369_v43, %v163_v49 }
 0x122   :  { %v1333_v50 = vpack.c.bf16 %v595_v41, %v591_v39  ;;  %v1299_v51 = vpack.c.bf16 %v594_v42, %v590_v40  ;;  %v532_v52 = vpop.f32.mrb[29].mxu1  ;;  %v531_v56 = vadd.f32 %v530_v47, %v163_v49  ;;  %v372_v57 = vadd.f32 %v371_v48, %v163_v49 }
 0x123   :  { %v1331_v53 = vpack.c.bf16 %v596_v46, %v592_v44  ;;  %v533_v59 = vadd.f32 %v532_v52, %v163_v49  ;;  %v597_v2 = vmax.f32 %v370_v54, 0.0 }
 0x124   :  { %v375_v58 = vpop.f32.mrb[30].mxu0  ;;  %1300 = vmatprep.subr.bf16.mxu0 %v1299_v51  ;;  %v599_v6 = vmax.f32 %v531_v56, 0.0  ;;  %v598_v7 = vmax.f32 %v372_v57, 0.0 }
 0x125   :  { %v376_v60 = vadd.f32 %v375_v58, %v168_v55  ;;  %v536_v61 = vpop.f32.mrb[30].mxu1  ;;  %1332 = vmatprep.subr.bf16.mxu1 %v1331_v53  ;;  %v377_v62 = vpop.f32.mrb[31].mxu0  ;;  %1302 = vmatpush1.bf16.msra.mxu0 %v1301_v45  ;;  %v600_v10 = vmax.f32 %v533_v59, 0.0 }
 0x126   :  { %v537_v63 = vadd.f32 %v536_v61, %v168_v55  ;;  %v378_v0 = vadd.f32 %v377_v62, %v168_v55  ;;  %v538_v1 = vpop.f32.mrb[31].mxu1  ;;  %1334 = vmatpush1.bf16.msra.mxu1 %v1333_v50  ;;  %v634_v53 = vpop.permute.xlu0 %633 }
 0x127   :  { %v601_v4 = vmax.f32 %v376_v60, 0.0  ;;  %v539_v5 = vadd.f32 %v538_v1, %v168_v55  ;;  %v639_v59 = vpop.permute.xlu1 %638 }
 0x128   :  { %v603_v8 = vmax.f32 %v537_v63, 0.0  ;;  %v602_v9 = vmax.f32 %v378_v0, 0.0 }
 0x129   :  { %v1305_v11 = vpack.c.bf16 %v601_v4, %v597_v2  ;;  %v604_v12 = vmax.f32 %v539_v5, 0.0 }
 0x12a   :  { %v1337_v13 = vpack.c.bf16 %v603_v8, %v599_v6  ;;  %v1303_v14 = vpack.c.bf16 %v602_v9, %v598_v7 }
 0x12b   :  { %v1335_v15 = vpack.c.bf16 %v604_v12, %v600_v10 }
 0x12c   :  { %1304 = vmatprep.subr.bf16.mxu0 %v1303_v14 }
 0x12d   :  { %1336 = vmatprep.subr.bf16.mxu1 %v1335_v15  ;;  %1306 = vmatpush1.bf16.msra.mxu0 %v1305_v11 }
 0x12e   :  { %1338 = vmatpush1.bf16.msra.mxu1 %v1337_v13 }
 0x130   :  { %726 = vmatmul.mubr.f32.vlgmr.msra.gmra.mrb[32].mxu0 %v605_v16 }
 0x131   :  { %839 = vmatmul.mubr.f32.vlgmr.msra.gmra.mrb[32].mxu1 %v605_v16  ;;  %731 = vmatprep.mubr.f32.mxu0 %v1408_v3 }
 0x132   :  { %844 = vmatprep.mubr.f32.mxu1 %v1408_v3 }
 0x134   :  { %732 = vmatmul.mubr.f32.gmra.mrb[34].mxu0 %v606_v17 }
 0x135   :  { %845 = vmatmul.mubr.f32.gmra.mrb[34].mxu1 %v606_v17  ;;  %737 = vmatprep.mubr.f32.mxu0 %v1408_v3 }
 0x136   :  { %850 = vmatprep.mubr.f32.mxu1 %v1408_v3 }
 0x138   :  { %738 = vmatmul.mubr.f32.gmra.mrb[36].mxu0 %v607_v18 }
 0x139   :  { %851 = vmatmul.mubr.f32.gmra.mrb[36].mxu1 %v607_v18  ;;  %743 = vmatprep.mubr.f32.mxu0 %v1408_v3 }
 0x13a   :  { %856 = vmatprep.mubr.f32.mxu1 %v1408_v3 }
 0x13c   :  { %744 = vmatmul.mubr.f32.gmra.mrb[38].mxu0 %v608_v19 }
 0x13d   :  { %857 = vmatmul.mubr.f32.gmra.mrb[38].mxu1 %v608_v19  ;;  %749 = vmatprep.mubr.f32.mxu0 %v1408_v3 }
 0x13e   :  { %862 = vmatprep.mubr.f32.mxu1 %v1408_v3 }
 0x140   :  { %750 = vmatmul.mubr.f32.gmra.mrb[40].mxu0 %v609_v20 }
 0x141   :  { %863 = vmatmul.mubr.f32.gmra.mrb[40].mxu1 %v609_v20  ;;  %755 = vmatprep.mubr.f32.mxu0 %v1408_v3  ;;  %v644_v20 = vpop.permute.xlu0 %643 }
 0x142   :  { %868 = vmatprep.mubr.f32.mxu1 %v1408_v3 }
 0x144   :  { %756 = vmatmul.mubr.f32.gmra.mrb[42].mxu0 %v610_v21 }
 0x145   :  { %869 = vmatmul.mubr.f32.gmra.mrb[42].mxu1 %v610_v21  ;;  %761 = vmatprep.mubr.f32.mxu0 %v1408_v3 }
 0x146   :  { %874 = vmatprep.mubr.f32.mxu1 %v1408_v3 }
 0x148   :  { %762 = vmatmul.mubr.f32.gmra.mrb[44].mxu0 %v611_v22 }
 0x149   :  { %875 = vmatmul.mubr.f32.gmra.mrb[44].mxu1 %v611_v22  ;;  %767 = vmatprep.mubr.f32.mxu0 %v1408_v3 }
 0x14a   :  { %880 = vmatprep.mubr.f32.mxu1 %v1408_v3 }
 0x14c   :  { %768 = vmatmul.mubr.f32.gmra.mrb[46].mxu0 %v612_v23 }
 0x14d   :  { %881 = vmatmul.mubr.f32.gmra.mrb[46].mxu1 %v612_v23  ;;  %993 = vmatprep.mubr.f32.mxu0 %v1408_v3 }
 0x14e   :  { %1064 = vmatprep.mubr.f32.mxu1 %v1408_v3 }
 0x203   :  { %v727_v24 = vpop.f32.mrb[32].mxu0 }
 0x204   :  { %v840_v25 = vpop.f32.mrb[32].mxu1  ;;  %v729_v26 = vpop.f32.mrb[33].mxu0  ;;  %v728_v29 = vadd.f32 %v727_v24, %v624_v27 }
 0x205   :  { %v842_v28 = vpop.f32.mrb[33].mxu1  ;;  %v841_v31 = vadd.f32 %v840_v25, %v624_v27  ;;  %v730_v32 = vadd.f32 %v729_v26, %v624_v27  ;;  %v649_v26 = vpop.permute.xlu1 %648 }
 0x206   :  { %v843_v34 = vadd.f32 %v842_v28, %v624_v27  ;;  %v887_v41 = vmax.f32 %v728_v29, 0.0 }
 0x207   :  { %v733_v33 = vpop.f32.mrb[34].mxu0  ;;  %v889_v43 = vmax.f32 %v841_v31, 0.0  ;;  %v888_v44 = vmax.f32 %v730_v32, 0.0 }
 0x208   :  { %v734_v35 = vadd.f32 %v733_v33, %v629_v30  ;;  %v846_v36 = vpop.f32.mrb[34].mxu1  ;;  %v735_v37 = vpop.f32.mrb[35].mxu0  ;;  %v890_v48 = vmax.f32 %v843_v34, 0.0 }
 0x209   :  { %v847_v38 = vadd.f32 %v846_v36, %v629_v30  ;;  %v736_v39 = vadd.f32 %v735_v37, %v629_v30  ;;  %v848_v40 = vpop.f32.mrb[35].mxu1 }
 0x20a   :  { %v891_v42 = vmax.f32 %v734_v35, 0.0  ;;  %v849_v3 = vadd.f32 %v848_v40, %v629_v30 }
 0x20b   :  { %v893_v45 = vmax.f32 %v847_v38, 0.0  ;;  %v892_v46 = vmax.f32 %v736_v39, 0.0  ;;  %v739_v47 = vpop.f32.mrb[36].mxu0 }
 0x20c   :  { %v1341_v49 = vpack.c.bf16 %v891_v42, %v887_v41  ;;  %v894_v50 = vmax.f32 %v849_v3, 0.0  ;;  %v852_v51 = vpop.f32.mrb[36].mxu1  ;;  %v741_v52 = vpop.f32.mrb[37].mxu0  ;;  %v740_v58 = vadd.f32 %v739_v47, %v634_v53 }
 0x20d   :  { %v1357_v54 = vpack.c.bf16 %v893_v45, %v889_v43  ;;  %v1339_v55 = vpack.c.bf16 %v892_v46, %v888_v44  ;;  %v854_v56 = vpop.f32.mrb[37].mxu1  ;;  %v853_v60 = vadd.f32 %v852_v51, %v634_v53  ;;  %v742_v61 = vadd.f32 %v741_v52, %v634_v53 }
 0x20e   :  { %v1355_v57 = vpack.c.bf16 %v894_v50, %v890_v48  ;;  %v855_v63 = vadd.f32 %v854_v56, %v634_v53  ;;  %v895_v7 = vmax.f32 %v740_v58, 0.0 }
 0x20f   :  { %v745_v62 = vpop.f32.mrb[38].mxu0  ;;  %1340 = vmatprep.subr.bf16.mxu0 %v1339_v55  ;;  %v897_v10 = vmax.f32 %v853_v60, 0.0  ;;  %v896_v11 = vmax.f32 %v742_v61, 0.0  ;;  %v659_v55 = vpop.permute.xlu1 %658 }
 0x210   :  { %v746_v0 = vadd.f32 %v745_v62, %v639_v59  ;;  %v858_v1 = vpop.f32.mrb[38].mxu1  ;;  %1356 = vmatprep.subr.bf16.mxu1 %v1355_v57  ;;  %v747_v2 = vpop.f32.mrb[39].mxu0  ;;  %1342 = vmatpush1.bf16.msra.mxu0 %v1341_v49  ;;  %v898_v15 = vmax.f32 %v855_v63, 0.0 }
 0x211   :  { %v859_v4 = vadd.f32 %v858_v1, %v639_v59  ;;  %v748_v5 = vadd.f32 %v747_v2, %v639_v59  ;;  %v860_v6 = vpop.f32.mrb[39].mxu1  ;;  %1358 = vmatpush1.bf16.msra.mxu1 %v1357_v54  ;;  %v654_v49 = vpop.permute.xlu0 %653 }
 0x212   :  { %v899_v8 = vmax.f32 %v746_v0, 0.0  ;;  %v861_v9 = vadd.f32 %v860_v6, %v639_v59 }
 0x213   :  { %v901_v12 = vmax.f32 %v859_v4, 0.0  ;;  %v900_v13 = vmax.f32 %v748_v5, 0.0  ;;  %v751_v14 = vpop.f32.mrb[40].mxu0 }
 0x214   :  { %v1345_v16 = vpack.c.bf16 %v899_v8, %v895_v7  ;;  %v902_v17 = vmax.f32 %v861_v9, 0.0  ;;  %v864_v18 = vpop.f32.mrb[40].mxu1  ;;  %v753_v19 = vpop.f32.mrb[41].mxu0  ;;  %v752_v25 = vadd.f32 %v751_v14, %v644_v20 }
 0x215   :  { %v1361_v21 = vpack.c.bf16 %v901_v12, %v897_v10  ;;  %v1343_v22 = vpack.c.bf16 %v900_v13, %v896_v11  ;;  %v866_v23 = vpop.f32.mrb[41].mxu1  ;;  %v865_v27 = vadd.f32 %v864_v18, %v644_v20  ;;  %v754_v28 = vadd.f32 %v753_v19, %v644_v20 }
 0x216   :  { %v1359_v24 = vpack.c.bf16 %v902_v17, %v898_v15  ;;  %v867_v30 = vadd.f32 %v866_v23, %v644_v20  ;;  %v903_v37 = vmax.f32 %v752_v25, 0.0  ;;  %v924_v17 = vpop.permute.xlu0 %923 }
 0x217   :  { %v757_v29 = vpop.f32.mrb[42].mxu0  ;;  %1344 = vmatprep.subr.bf16.mxu0 %v1343_v22  ;;  %v905_v40 = vmax.f32 %v865_v27, 0.0  ;;  %v904_v41 = vmax.f32 %v754_v28, 0.0 }
 0x218   :  { %v758_v31 = vadd.f32 %v757_v29, %v649_v26  ;;  %v870_v32 = vpop.f32.mrb[42].mxu1  ;;  %1360 = vmatprep.subr.bf16.mxu1 %v1359_v24  ;;  %v759_v33 = vpop.f32.mrb[43].mxu0  ;;  %1346 = vmatpush1.bf16.msra.mxu0 %v1345_v16  ;;  %v906_v44 = vmax.f32 %v867_v30, 0.0  ;;  %v919_v16 = vld [vmem:[%s1837_s5] sm:$0x3] }
 0x219   :  { %v871_v34 = vadd.f32 %v870_v32, %v649_v26  ;;  %v760_v35 = vadd.f32 %v759_v33, %v649_v26  ;;  %v872_v36 = vpop.f32.mrb[43].mxu1  ;;  %1362 = vmatpush1.bf16.msra.mxu1 %v1361_v21 }
 0x21a   :  { %v907_v38 = vmax.f32 %v758_v31, 0.0  ;;  %v873_v39 = vadd.f32 %v872_v36, %v649_v26 }
 0x21b   :  { %v909_v42 = vmax.f32 %v871_v34, 0.0  ;;  %v908_v3 = vmax.f32 %v760_v35, 0.0  ;;  %v763_v43 = vpop.f32.mrb[44].mxu0 }
 0x21c   :  { %v1349_v45 = vpack.c.bf16 %v907_v38, %v903_v37  ;;  %v910_v46 = vmax.f32 %v873_v39, 0.0  ;;  %v876_v47 = vpop.f32.mrb[44].mxu1  ;;  %v765_v48 = vpop.f32.mrb[45].mxu0  ;;  %v764_v54 = vadd.f32 %v763_v43, %v654_v49 }
 0x21d   :  { %v1365_v50 = vpack.c.bf16 %v909_v42, %v905_v40  ;;  %v1347_v51 = vpack.c.bf16 %v908_v3, %v904_v41  ;;  %v878_v52 = vpop.f32.mrb[45].mxu1  ;;  %v877_v56 = vadd.f32 %v876_v47, %v654_v49  ;;  %v766_v57 = vadd.f32 %v765_v48, %v654_v49 }
 0x21e   :  { %v1363_v53 = vpack.c.bf16 %v910_v46, %v906_v44  ;;  %v879_v59 = vadd.f32 %v878_v52, %v654_v49  ;;  %v911_v2 = vmax.f32 %v764_v54, 0.0  ;;  %v1071_v49 = vlaneseq }
 0x21f   :  { %v769_v58 = vpop.f32.mrb[46].mxu0  ;;  %1348 = vmatprep.subr.bf16.mxu0 %v1347_v51  ;;  %v913_v6 = vmax.f32 %v877_v56, 0.0  ;;  %v912_v7 = vmax.f32 %v766_v57, 0.0 }
 0x220   :  { %v770_v60 = vadd.f32 %v769_v58, %v659_v55  ;;  %v882_v61 = vpop.f32.mrb[46].mxu1  ;;  %1364 = vmatprep.subr.bf16.mxu1 %v1363_v53  ;;  %v771_v62 = vpop.f32.mrb[47].mxu0  ;;  %1350 = vmatpush1.bf16.msra.mxu0 %v1349_v45  ;;  %v914_v10 = vmax.f32 %v879_v59, 0.0  ;;  %v1797_v58 = vshrl.u32 %v1071_v49, 7 }
 0x221   :  { %v883_v63 = vadd.f32 %v882_v61, %v659_v55  ;;  %v772_v0 = vadd.f32 %v771_v62, %v659_v55  ;;  %v884_v1 = vpop.f32.mrb[47].mxu1  ;;  %1366 = vmatpush1.bf16.msra.mxu1 %v1365_v50 }
 0x222   :  { %v915_v4 = vmax.f32 %v770_v60, 0.0  ;;  %v885_v5 = vadd.f32 %v884_v1, %v659_v55  ;;  %vm1073_vm6 = vcmp.eq.s32.totalorder %v1797_v58, 0 }
 0x223   :  { %v917_v8 = vmax.f32 %v883_v63, 0.0  ;;  %v916_v9 = vmax.f32 %v772_v0, 0.0  ;;  %v1410_v0 = vmov 1983009808  }
 0x224   :  { %v1353_v11 = vpack.c.bf16 %v915_v4, %v911_v2  ;;  %v918_v12 = vmax.f32 %v885_v5, 0.0  ;;  %v1185_v1 = vunpack.c.l.s4 %v1410_v0 }
 0x225   :  { %v1369_v13 = vpack.c.bf16 %v917_v8, %v913_v6  ;;  %v1351_v14 = vpack.c.bf16 %v916_v9, %v912_v7 }
 0x226   :  { %v1367_v15 = vpack.c.bf16 %v918_v12, %v914_v10 }
 0x227   :  { %1352 = vmatprep.subr.bf16.mxu0 %v1351_v14 }
 0x228   :  { %1368 = vmatprep.subr.bf16.mxu1 %v1367_v15  ;;  %1354 = vmatpush1.bf16.msra.mxu0 %v1353_v11 }
 0x229   :  { %1370 = vmatpush1.bf16.msra.mxu1 %v1369_v13 }
 0x22b   :  { %1237 = vmatmul.mubr.msk.f32.vlgmr.msra.gmra.mrb[48].mxu0 %vm170_vm0, %v919_v16 }
 0x22c   :  { %1238 = vmatmul.mubr.msk.f32.vlgmr.msra.gmra.mrb[48].mxu1 %vm170_vm0, %v919_v16 }
 0x2fe   :  { %v995_v18 = vpop.f32.mrb[48].mxu0 }
 0x2ff   :  { %v1781_v19 = vadd.f32 %v995_v18, %v924_v17  ;;  %v1066_v20 = vpop.f32.mrb[48].mxu1  ;;  %v997_v21 = vpop.f32.mrb[49].mxu0 }
 0x300   :  { %v1783_v22 = vadd.f32 %v1066_v20, %v924_v17  ;;  %v1785_v23 = vadd.f32 %v997_v21, %v924_v17  ;;  %v1068_v24 = vpop.f32.mrb[49].mxu1 }
 0x301   :  { %v1110_v25 = vand.u32 2147483647, %v1781_v19  ;;  %v1790_v31 = vadd.f32 %v1068_v24, %v924_v17  ;;  %v1239_v34 = vmul.f32 -1.442695, %v1781_v19  ;;  %v1098_v61 = vmax.f32 %v1781_v19, 0.0 }
 0x302   :  { %v1112_v26 = vand.u32 2147483647, %v1783_v22  ;;  %v1111_v29 = vand.u32 2147483647, %v1785_v23  ;;  %v1240_v37 = vmul.f32 -1.442695, %v1785_v23  ;;  %vm1102_vm1 = vcmp.ne.f32.partialorder %v1781_v19, %v1781_v19 }
 0x303   :  { %v1114_v27 = vsub.f32 0.0, %v1110_v25  ;;  %v1113_v36 = vand.u32 2147483647, %v1790_v31  ;;  %v1241_v39 = vmul.f32 -1.442695, %v1783_v22  ;;  %v1100_v7 = vmax.f32 %v1783_v22, 0.0 }
 0x304   :  { %v1116_v28 = vsub.f32 0.0, %v1112_v26  ;;  %v1115_v33 = vsub.f32 0.0, %v1111_v29  ;;  %v1242_v41 = vmul.f32 -1.442695, %v1790_v31  ;;  %v1099_v16 = vmax.f32 %v1785_v23, 0.0 }
 0x305   :  { %v1118_v30 = vmul.f32 1.442695, %v1114_v27  ;;  %v1117_v38 = vsub.f32 0.0, %v1113_v36  ;;  %vm1104_vm5 = vcmp.ne.f32.partialorder %v1783_v22, %v1783_v22  ;;  %vm1103_vm7 = vcmp.ne.f32.partialorder %v1785_v23, %v1785_v23 }
 0x306   :  { %v1122_v32 = vmul.f32 1.442695, %v1116_v28  ;;  %v1120_v35 = vmul.f32 1.442695, %v1115_v33  ;;  %vm1105_vm9 = vcmp.ne.f32.partialorder %v1790_v31, %v1790_v31 }
 0x307   :  { %1376 = vpow2.f32 %v1118_v30  ;;  %v1124_v40 = vmul.f32 1.442695, %v1117_v38 }
 0x308   :  { %1378 = vpow2.f32 %v1122_v32 }
 0x309   :  { %1380 = vpow2.f32 %v1120_v35 }
 0x30a   :  { %1382 = vpow2.f32 %v1239_v34 }
 0x30b   :  { %1384 = vpow2.f32 %v1240_v37 }
 0x30c   :  { %1386 = vpow2.f32 %v1124_v40  ;;  %v1101_v40 = vmax.f32 %v1790_v31, 0.0 }
 0x30d   :  { %1388 = vpow2.f32 %v1241_v39 }
 0x30e   :  { %1390 = vpow2.f32 %v1242_v41 }
 0x311   :  { %v1377_v42 = vpop.eup %1376 }
 0x312   :  { %v1379_v3 = vpop.eup %1378  ;;  %v1126_v43 = vadd.f32 1.0, %v1377_v42  ;;  %v1129_v50 = vmul.f32 -0.5, %v1377_v42  ;;  %v1132_v62 = vand.u32 2147483647, %v1377_v42 }
 0x313   :  { %v1144_v44 = vadd.f32 1.0, %v1379_v3  ;;  %v1381_v45 = vpop.eup %1380  ;;  %v1147_v52 = vmul.f32 -0.5, %v1379_v3  ;;  %v1150_v4 = vand.u32 2147483647, %v1379_v3 }
 0x314   :  { %1392 = vlog2.f32 %v1126_v43  ;;  %v1135_v46 = vadd.f32 1.0, %v1381_v45  ;;  %v1383_v47 = vpop.eup %1382  ;;  %v1138_v54 = vmul.f32 -0.5, %v1381_v45  ;;  %v1130_v59 = vadd.f32 1.0, %v1129_v50 }
 0x315   :  { %1394 = vlog2.f32 %v1144_v44  ;;  %v1385_v48 = vpop.eup %1384  ;;  %v1086_v53 = vadd.f32 1.0, %v1383_v47  ;;  %v1148_v63 = vadd.f32 1.0, %v1147_v52  ;;  %v1141_v12 = vand.u32 2147483647, %v1381_v45 }
 0x316   :  { %1396 = vlog2.f32 %v1135_v46  ;;  %v1387_v51 = vpop.eup %1386  ;;  %v1087_v57 = vadd.f32 1.0, %v1385_v48  ;;  %v1139_v5 = vadd.f32 1.0, %v1138_v54  ;;  %v1131_v11 = vmul.f32 %v1377_v42, %v1130_v59 }
 0x317   :  { %v1153_v55 = vadd.f32 1.0, %v1387_v51  ;;  %v1389_v56 = vpop.eup %1388  ;;  %v1156_v8 = vmul.f32 -0.5, %v1387_v51  ;;  %vm1133_vm2 = vcmp.lt.f32.partialorder %v1132_v62, 0.0004427343  ;;  %v1149_v15 = vmul.f32 %v1379_v3, %v1148_v63 }
 0x318   :  { %v1391_v60 = vpop.eup %1390  ;;  %v1088_v2 = vadd.f32 1.0, %v1389_v56  ;;  %vm1151_vm3 = vcmp.lt.f32.partialorder %v1150_v4, 0.0004427343  ;;  %v1140_v20 = vmul.f32 %v1381_v45, %v1139_v5  ;;  %vm1142_vm4 = vcmp.lt.f32.partialorder %v1141_v12, 0.0004427343 }
 0x319   :  { %1398 = vlog2.f32 %v1153_v55  ;;  %v1089_v13 = vadd.f32 1.0, %v1391_v60  ;;  %v1157_v26 = vadd.f32 1.0, %v1156_v8  ;;  %v1159_v28 = vand.u32 2147483647, %v1387_v51 }
 0x31a   :  { %1400 = vrcp.f32 %v1086_v53 }
 0x31b   :  { %1402 = vrcp.f32 %v1087_v57  ;;  %v1158_v37 = vmul.f32 %v1387_v51, %v1157_v26  ;;  %vm1160_vm8 = vcmp.lt.f32.partialorder %v1159_v28, 0.0004427343 }
 0x31c   :  { %1404 = vrcp.f32 %v1088_v2 }
 0x31d   :  { %1406 = vrcp.f32 %v1089_v13 }
 0x31e   :  { %v1393_v6 = vpop.eup %1392 }
 0x31f   :  { %v1395_v9 = vpop.eup %1394  ;;  %v1128_v10 = vmul.f32 0.6931472, %v1393_v6 }
 0x320   :  { %v1146_v14 = vmul.f32 0.6931472, %v1395_v9  ;;  %v1397_v17 = vpop.eup %1396 }
 0x321   :  { %v1134_v18 = vsel %vm1133_vm2, %v1131_v11, %v1128_v10  ;;  %v1137_v25 = vmul.f32 0.6931472, %v1397_v17 }
 0x322   :  { %v1162_v21 = vadd.f32 %v1134_v18, %v1098_v61  ;;  %v1152_v24 = vsel %vm1151_vm3, %v1149_v15, %v1146_v14 }
 0x323   :  { %v1164_v27 = vadd.f32 %v1152_v24, %v1100_v7  ;;  %v1143_v30 = vsel %vm1142_vm4, %v1140_v20, %v1137_v25  ;;  %v1399_v32 = vpop.eup %1398 }
 0x324   :  { %v1166_v29 = vsel %vm1102_vm1, %v1781_v19, %v1162_v21  ;;  %v1163_v35 = vadd.f32 %v1143_v30, %v1099_v16  ;;  %v1155_v36 = vmul.f32 0.6931472, %v1399_v32  ;;  %v1401_v38 = vpop.eup %1400  ;;  %v1186_v19 = vunpack.c.0.s8 %v1185_v1 }
 0x325   :  { %v1170_v33 = vadd.f32 1e-06, %v1166_v29  ;;  %v1168_v34 = vsel %vm1104_vm5, %v1783_v22, %v1164_v27  ;;  %v1403_v41 = vpop.eup %1402 }
 0x326   :  { %v1167_v39 = vsel %vm1103_vm7, %v1785_v23, %v1163_v35  ;;  %v1172_v3 = vadd.f32 1e-06, %v1168_v34  ;;  %v1161_v22 = vsel %vm1160_vm8, %v1158_v37, %v1155_v36  ;;  %v1405_v46 = vpop.eup %1404  ;;  %v1189_v47 = vsub.s32 %v1186_v19, %v1797_v58 }
 0x327   :  { %v1174_v42 = vsel %vm1073_vm6, %v1401_v38, %v1170_v33  ;;  %v1171_v43 = vadd.f32 1e-06, %v1167_v39  ;;  %v1165_v44 = vadd.f32 %v1161_v22, %v1101_v40  ;;  %v1407_v51 = vpop.eup %1406 }
 0x328   :  { %v1176_v49 = vsel %vm1073_vm6, %v1405_v46, %v1172_v3 }
 0x329   :  { %v1175_v45 = vsel %vm1073_vm6, %v1403_v41, %v1171_v43  ;;  %v1169_v48 = vsel %vm1105_vm9, %v1790_v31, %v1165_v44 }
 0x32a   :  { %v1182_v23 = vcombine.low %v1174_v42, %v1175_v45  ;;  %v1173_v50 = vadd.f32 1e-06, %v1169_v48 }
 0x32c   :  { %v1177_v52 = vsel %vm1073_vm6, %v1407_v51, %v1173_v50  ;;  %v1190_v53 = vrot.slane %v1182_v23, %v1189_v47 }
 0x32d   :  { %v1183_v54 = vcombine.low %v1176_v49, %v1177_v52 }
 0x32f   :  { %v1197_v55 = vrot.slane %v1183_v54, %v1189_v47 }
 0x331   :  { %v1198_v56 = vcombine.low %v1190_v53, %v1197_v55 }
 0x333   :  { %1200 = vst [vmem:[%s1838_s7] sm:$0xff] %v1198_v56 }

</bundles_post_ra>
